<compile_context>
chip_gen: v5e
topology: v5e:2x2
jax: 0.10.0
libtpu: 0.0.40
codegen_flags: <defaults>
</compile_context>

<pallas_src>
import jax
import jax.numpy as jnp
from jax.experimental import pallas as pl
from jax.experimental.pallas import tpu as pltpu


# ----------------------------------------------------------------------------- kernels
def _psi_kernel(bp_ref, g_ref, x_ref, wg_ref, wx_ref, b_ref, wp_ref, psi_ref):
    """Pass 1: attention logits -> psi for one (batch, HW-tile) block.

    bp_ref : SMEM (1,) f32 (scalar prefetch)
    g_ref  : (1, F_g, T) in g.dtype      x_ref : (1, F_l, T) in x.dtype
    wg_ref : (F_int, F_g) in g.dtype     wx_ref: (F_int, F_l) in x.dtype   (BN-folded)
    b_ref  : (F_int, 1) f32 (bg + bx, BN-folded)
    wp_ref : (1, F_int) f32
    psi_ref: (1, 1, T) f32
    """
    g = g_ref[0]                                    # (F_g, T)
    x = x_ref[0]                                    # (F_l, T)

    # Two 1x1 convs = channel matmuls sharing one f32 accumulator + one bias add (MXU).
    acc = jnp.dot(wg_ref[...], g, preferred_element_type=jnp.float32)
    acc = acc + jnp.dot(wx_ref[...], x, preferred_element_type=jnp.float32)
    a = jnp.maximum(acc + b_ref[...], 0.0)          # ReLU, (F_int, T) f32

    # psi projection on the MXU.
    logit = jnp.dot(wp_ref[...], a, preferred_element_type=jnp.float32) + bp_ref[0]
    psi_ref[0] = jax.nn.sigmoid(logit)              # (1, T) f32


def _apply_kernel(thr_ref, x_ref, psi_ref, o_ref):
    """Pass 2: out = x * where(psi >= thr[b], psi, 0) for one (batch, HW-tile) block.

    thr_ref: SMEM (N,) f32 (scalar prefetch)   x_ref: (1, F_l, T) in x.dtype
    psi_ref: (1, 1, T) f32                     o_ref: (1, F_l, T) in x.dtype
    """
    b = pl.program_id(0)
    thr = thr_ref[b]
    psi = psi_ref[0]                                               # (1, T) f32
    sparse = jnp.where(psi >= thr, psi, 0.0)                       # (1, T) f32
    xv = x_ref[0]                                                  # (F_l, T) in x.dtype
    # Gating multiply runs in x.dtype (bf16-native on v6e/v7x when x is bf16, f32 otherwise).
    o_ref[0] = (xv * sparse.astype(xv.dtype)).astype(o_ref.dtype)


# ----------------------------------------------------------------------------- helpers
def _fold_conv_bn(w, b, gamma, beta, mean, var, eps=1e-5):
    """Fold Conv2d(1x1, bias) + BatchNorm2d (eval) into a single affine matmul."""
    s = gamma / jnp.sqrt(var + eps)                 # (out,)
    w_f = w * s[:, None]                            # (out, in)
    b_f = b * s + (beta - mean * s)                 # (out,)
    return w_f, b_f


def _vmem_budget_bytes():
    """VMEM budget for one pallas_call working set.

    Capped at 48 MiB: leaves headroom under v7x's 64 MiB physical VMEM and is comfortably
    under v5e/v6e's 128 MiB. vmem_limit_bytes is raised to this value explicitly, so the
    smaller default scoped limits (16 MiB v5e / 32 MiB v6e, v7x) do not force tiny tiles.
    """
    cap = 128 << 20
    try:
        cap = int(pltpu.get_tpu_info().vmem_capacity_bytes)
    except Exception:
        pass
    return int(min((cap * 3) // 4, 48 << 20))


def _pick_hw_tile(hw, n_batch, per_lane_bytes, fixed_bytes, budget_bytes):
    """Largest multiple-of-128 lane tile whose estimated working set fits the VMEM budget.

    Keeps at least two total grid blocks when n_batch == 1 so both v7x TensorCores get work.
    """
    base = -(-hw // 128) * 128                      # HW rounded up to a lane multiple
    avail = max(budget_bytes - fixed_bytes, per_lane_bytes * 128)
    t_max = max(128, (avail // per_lane_bytes) // 128 * 128)
    t = min(base, t_max)
    if n_batch == 1 and t >= base and base >= 256:
        t = -(-(base // 2) // 128) * 128            # split spatial axis so grid has >= 2 blocks
    return int(t)


# ----------------------------------------------------------------------------- wrapper
def sparse_attention_block(g, x, params, *, hw_tile=None, vmem_budget_bytes=None):
    """g: (N, F_g, H, W), x: (N, F_l, H, W) -> (N, F_l, H, W) in x.dtype (BN in eval mode)."""
    N, F_g, H, W = g.shape
    Nx, F_l, Hx, Wx = x.shape
    assert (N, H, W) == (Nx, Hx, Wx), "g/x batch and spatial dims must match"
    HW = H * W

    k = int(0.02 * H * W)
    assert 1 <= k <= HW, "int(0.02*H*W) must be in [1, H*W]"

    # Fold BatchNorm (eval) into the 1x1-conv weights/biases.
    wg_f, bg_f = _fold_conv_bn(params["wg"], params["bg"], *params["bn_g"])
    wx_f, bx_f = _fold_conv_bn(params["wx"], params["bx"], *params["bn_x"])
    wp_f, bp_f = _fold_conv_bn(params["wp"], params["bp"], *params["bn_p"])
    F_int = wg_f.shape[0]

    g_dt, x_dt = g.dtype, x.dtype
    gb = jnp.dtype(g_dt).itemsize
    xb = jnp.dtype(x_dt).itemsize
    ob = xb                                          # output is written in x.dtype by the kernel

    # Stream g/x in their native dtype; match weights to it (bf16 inputs -> bf16 MXU operands,
    # f32 accumulation). No wrapper-level dtype copies of the big activations.
    wg_c = wg_f.astype(g_dt) if gb < 4 else wg_f.astype(jnp.float32)
    wx_c = wx_f.astype(x_dt) if xb < 4 else wx_f.astype(jnp.float32)
    wgb = jnp.dtype(wg_c.dtype).itemsize
    wxb = jnp.dtype(wx_c.dtype).itemsize
    b_comb = (bg_f + bx_f).reshape(F_int, 1).astype(jnp.float32)    # single combined bias add
    wp2 = wp_f.reshape(1, F_int).astype(jnp.float32)
    bp2 = bp_f.reshape(1).astype(jnp.float32)

    # ---- VMEM-budget-aware lane-tile selection ---------------------------------------
    budget = int(vmem_budget_bytes) if vmem_budget_bytes is not None else _vmem_budget_bytes()
    # Per-lane VMEM bytes (double-buffered blocks + f32 intermediates), with margin.
    per_lane_p1 = 2 * (F_g * gb + F_l * xb) + 2 * 4 + 2 * F_int * 4
    per_lane_p2 = 2 * (F_l * xb + 4 + F_l * ob) + F_l * 4
    per_lane = int(1.25 * max(per_lane_p1, per_lane_p2))
    fixed = 2 * (F_int * F_g * wgb + F_int * F_l * wxb + 2 * F_int * 4) + (64 << 10)

    if hw_tile is not None:
        T = -(-int(hw_tile) // 128) * 128            # user tile, rounded up to a lane multiple
    else:
        T = _pick_hw_tile(HW, N, per_lane, fixed, budget)
    HW_pad = -(-HW // T) * T
    n_t = HW_pad // T
    assert T % 128 == 0 and HW_pad % T == 0

    g2 = g.reshape(N, F_g, HW)
    x2 = x.reshape(N, F_l, HW)
    if HW_pad != HW:
        pad = HW_pad - HW
        g2 = jnp.pad(g2, ((0, 0), (0, 0), (0, pad)))
        x2 = jnp.pad(x2, ((0, 0), (0, 0), (0, pad)))

    cparams = pltpu.CompilerParams(
        dimension_semantics=("parallel", "parallel"),
        vmem_limit_bytes=budget,
    )

    # ---- pass 1: psi map, tiled over (batch, HW) -------------------------------------
    p1_cost = pl.CostEstimate(
        flops=2 * N * HW_pad * F_int * (F_g + F_l + 1),
        transcendentals=N * HW_pad,
        bytes_accessed=N * HW_pad * (F_g * gb + F_l * xb + 4)
        + F_int * (F_g * wgb + F_l * wxb) + 2 * F_int * 4,
    )
    psi = pl.pallas_call(
        _psi_kernel,
        out_shape=jax.ShapeDtypeStruct((N, 1, HW_pad), jnp.float32),
        grid_spec=pltpu.PrefetchScalarGridSpec(
            num_scalar_prefetch=1,                  # bp -> SMEM scalar
            grid=(N, n_t),
            in_specs=[
                pl.BlockSpec((1, F_g, T), lambda b, t, bp: (b, 0, t)),
                pl.BlockSpec((1, F_l, T), lambda b, t, bp: (b, 0, t)),
                pl.BlockSpec((F_int, F_g), lambda b, t, bp: (0, 0)),
                pl.BlockSpec((F_int, F_l), lambda b, t, bp: (0, 0)),
                pl.BlockSpec((F_int, 1), lambda b, t, bp: (0, 0)),
                pl.BlockSpec((1, F_int), lambda b, t, bp: (0, 0)),
            ],
            out_specs=pl.BlockSpec((1, 1, T), lambda b, t, bp: (b, 0, t)),
        ),
        compiler_params=cparams,
        cost_estimate=p1_cost,
    )(bp2, g2, x2, wg_c, wx_c, b_comb, wp2)

    # ---- per-image k-th-largest threshold on the tiny (N, HW) psi map -----------------
    # TODO(synk): for very large HW (>=~256K pixels) replace top_k (full per-row sort) with a
    # histogram / binary-search threshold over psi in (0,1) to stay HBM-roofline bound.
    thr = jax.lax.top_k(psi[:, 0, :HW], k)[0][:, -1]                 # (N,) f32

    # ---- pass 2: apply sparse gate, tiled over (batch, HW), written in x.dtype --------
    p2_cost = pl.CostEstimate(
        flops=2 * N * HW_pad * F_l,
        transcendentals=0,
        bytes_accessed=N * HW_pad * (F_l * xb + 4 + F_l * ob),
    )
    out = pl.pallas_call(
        _apply_kernel,
        out_shape=jax.ShapeDtypeStruct((N, F_l, HW_pad), x_dt),
        grid_spec=pltpu.PrefetchScalarGridSpec(
            num_scalar_prefetch=1,                  # per-batch thresholds -> SMEM
            grid=(N, n_t),
            in_specs=[
                pl.BlockSpec((1, F_l, T), lambda b, t, thr: (b, 0, t)),
                pl.BlockSpec((1, 1, T), lambda b, t, thr: (b, 0, t)),
            ],
            out_specs=pl.BlockSpec((1, F_l, T), lambda b, t, thr: (b, 0, t)),
        ),
        compiler_params=cparams,
        cost_estimate=p2_cost,
    )(thr, x2, psi)

    if HW_pad != HW:
        out = out[:, :, :HW]
    return out.reshape(N, F_l, H, W)


# ----------------------------------------------------------------------------- reference
def _reference(g, x, params):
    """Pure-JAX f32 reference of the PyTorch forward (BN in eval mode)."""
    wg_f, bg_f = _fold_conv_bn(params["wg"], params["bg"], *params["bn_g"])
    wx_f, bx_f = _fold_conv_bn(params["wx"], params["bx"], *params["bn_x"])
    wp_f, bp_f = _fold_conv_bn(params["wp"], params["bp"], *params["bn_p"])
    g = g.astype(jnp.float32)
    x = x.astype(jnp.float32)
    N, _, H, W = g.shape
    g1 = jnp.einsum("oc,nchw->nohw", wg_f, g) + bg_f[None, :, None, None]
    x1 = jnp.einsum("oc,nchw->nohw", wx_f, x) + bx_f[None, :, None, None]
    a = jnp.maximum(g1 + x1, 0.0)
    logit = jnp.einsum("oc,nchw->nohw", wp_f, a) + bp_f[None, :, None, None]
    psi = jax.nn.sigmoid(logit)
    k = int(0.02 * H * W)
    topk_vals = jax.lax.top_k(psi.reshape(N, -1), k)[0]
    thr = topk_vals[:, -1][:, None, None, None]
    sparse_psi = jnp.where(psi >= thr, psi, jnp.zeros_like(psi))
    return x * sparse_psi


# ----------------------------------------------------------------------------- self-test
if __name__ == "__main__":
    key = jax.random.PRNGKey(0)
    N, F_g, F_l, F_int, H, W = 2, 4, 4, 8, 16, 16      # int(0.02*16*16) = 5 -> top-5

    ks = jax.random.split(key, 18)
    g = jax.random.normal(ks[0], (N, F_g, H, W), jnp.float32)
    x = jax.random.normal(ks[1], (N, F_l, H, W), jnp.float32)

    def bn_params(k1, k2, k3, k4, c):
        gamma = 1.0 + 0.1 * jax.random.normal(k1, (c,), jnp.float32)
        beta = 0.1 * jax.random.normal(k2, (c,), jnp.float32)
        mean = 0.1 * jax.random.normal(k3, (c,), jnp.float32)
        var = 0.5 + jnp.abs(jax.random.normal(k4, (c,), jnp.float32))
        return gamma, beta, mean, var

    params = {
        "wg": 0.3 * jax.random.normal(ks[2], (F_int, F_g), jnp.float32),
        "bg": 0.1 * jax.random.normal(ks[3], (F_int,), jnp.float32),
        "bn_g": bn_params(ks[4], ks[5], ks[6], ks[7], F_int),
        "wx": 0.3 * jax.random.normal(ks[8], (F_int, F_l), jnp.float32),
        "bx": 0.1 * jax.random.normal(ks[9], (F_int,), jnp.float32),
        "bn_x": bn_params(ks[10], ks[11], ks[12], ks[13], F_int),
        "wp": 0.3 * jax.random.normal(ks[14], (1, F_int), jnp.float32),
        "bp": 0.1 * jax.random.normal(ks[15], (1,), jnp.float32),
        "bn_p": (jnp.ones((1,), jnp.float32), jnp.zeros((1,), jnp.float32),
                 jnp.zeros((1,), jnp.float32), jnp.ones((1,), jnp.float32)),
    }

    ref = _reference(g, x, params)

    # f32 path, default (budget-selected) tile: grid = (2, 1).
    out = jax.block_until_ready(sparse_attention_block(g, x, params))
    assert out.shape == (N, F_l, H, W) and out.dtype == x.dtype
    assert jnp.allclose(out, ref, atol=1e-4, rtol=1e-4), "f32 mismatch vs. JAX reference"

    # f32 path, forced 128-lane tile to exercise the spatial tiling: grid = (2, 2).
    out_t = jax.block_until_ready(sparse_attention_block(g, x, params, hw_tile=128))
    assert jnp.allclose(out_t, ref, atol=1e-4, rtol=1e-4), "tiled f32 mismatch vs. reference"

    # Non-multiple-of-128 spatial size to exercise the lane-padding path (HW = 400 -> 512).
    H2, W2 = 20, 20
    g2 = jax.random.normal(ks[16], (N, F_g, H2, W2), jnp.float32)
    x2 = jax.random.normal(ks[17], (N, F_l, H2, W2), jnp.float32)
    out2 = jax.block_until_ready(sparse_attention_block(g2, x2, params))
    ref2 = _reference(g2, x2, params)
    assert out2.shape == (N, F_l, H2, W2)
    assert jnp.allclose(out2, ref2, atol=1e-4, rtol=1e-4), "padded f32 mismatch vs. reference"

    # bf16-input path (native bf16 streaming + bf16 gating multiply, f32 MXU accumulation):
    # check shape/dtype/finiteness only — a bf16-rounded psi can flip the top-k boundary,
    # so a tight element-wise compare against the f32 reference would be flaky by design.
    gb16 = g.astype(jnp.bfloat16)
    xb16 = x.astype(jnp.bfloat16)
    out_b = jax.block_until_ready(sparse_attention_block(gb16, xb16, params))
    assert out_b.shape == (N, F_l, H, W) and out_b.dtype == jnp.bfloat16
    assert bool(jnp.isfinite(out_b.astype(jnp.float32)).all()), "bf16 output not finite"

    print("KERNEL_OK")
</pallas_src>

<mosaic_0001>
module attributes {stable_mosaic.version = 11 : i64} {
  func.func @_psi_kernel(%arg0: i32, %arg1: i32, %arg2: memref<1xf32, #tpu.memory_space<smem>>, %arg3: memref<1x4x256xf32, #tpu.memory_space<vmem>>, %arg4: memref<1x4x256xf32, #tpu.memory_space<vmem>>, %arg5: memref<8x4xf32, #tpu.memory_space<vmem>>, %arg6: memref<8x4xf32, #tpu.memory_space<vmem>>, %arg7: memref<8x1xf32, #tpu.memory_space<vmem>>, %arg8: memref<1x8xf32, #tpu.memory_space<vmem>>, %arg9: memref<1x1x256xf32, #tpu.memory_space<vmem>>) attributes {dimension_semantics = [#tpu.dimension_semantics<parallel>, #tpu.dimension_semantics<parallel>], iteration_bounds = array<i64: 2, 1>, scalar_prefetch = 1 : i64, scratch_operands = 0 : i64, tpu.core_type = #tpu.core_type<tc>, window_params = [{transform_indices = @transform_0, window_bounds = array<i64: 1, 4, 256>}, {transform_indices = @transform_1, window_bounds = array<i64: 1, 4, 256>}, {pipeline_mode = #tpu.pipeline_mode<synchronous>, transform_indices = @transform_2, window_bounds = array<i64: 8, 4>}, {pipeline_mode = #tpu.pipeline_mode<synchronous>, transform_indices = @transform_3, window_bounds = array<i64: 8, 4>}, {pipeline_mode = #tpu.pipeline_mode<synchronous>, transform_indices = @transform_4, window_bounds = array<i64: 8, 1>}, {pipeline_mode = #tpu.pipeline_mode<synchronous>, transform_indices = @transform_5, window_bounds = array<i64: 1, 8>}, {transform_indices = @transform_6, window_bounds = array<i64: 1, 1, 256>}]} {
    %c0 = arith.constant 0 : index
    %c0_0 = arith.constant 0 : index
    %c0_1 = arith.constant 0 : index
    %0 = vector.load %arg3[%c0, %c0_0, %c0_1] : memref<1x4x256xf32, #tpu.memory_space<vmem>>, vector<1x4x256xf32>
    %1 = vector.shape_cast %0 : vector<1x4x256xf32> to vector<4x256xf32>
    %c0_2 = arith.constant 0 : index
    %c0_3 = arith.constant 0 : index
    %c0_4 = arith.constant 0 : index
    %2 = vector.load %arg4[%c0_2, %c0_3, %c0_4] : memref<1x4x256xf32, #tpu.memory_space<vmem>>, vector<1x4x256xf32>
    %3 = vector.shape_cast %2 : vector<1x4x256xf32> to vector<4x256xf32>
    %c0_5 = arith.constant 0 : index
    %c0_6 = arith.constant 0 : index
    %4 = vector.load %arg5[%c0_5, %c0_6] : memref<8x4xf32, #tpu.memory_space<vmem>>, vector<8x4xf32>
    %cst = arith.constant dense<0.000000e+00> : vector<8x256xf32>
    %5 = tpu.matmul %4, %1, %cst {dimension_numbers = #tpu.dot_dimension_numbers<[1], [0], [0], [1], [0, 0, 1, 1], [], []>} : vector<8x4xf32>, vector<4x256xf32>, vector<8x256xf32> -> vector<8x256xf32>
    %c0_7 = arith.constant 0 : index
    %c0_8 = arith.constant 0 : index
    %6 = vector.load %arg6[%c0_7, %c0_8] : memref<8x4xf32, #tpu.memory_space<vmem>>, vector<8x4xf32>
    %cst_9 = arith.constant dense<0.000000e+00> : vector<8x256xf32>
    %7 = tpu.matmul %6, %3, %cst_9 {dimension_numbers = #tpu.dot_dimension_numbers<[1], [0], [0], [1], [0, 0, 1, 1], [], []>} : vector<8x4xf32>, vector<4x256xf32>, vector<8x256xf32> -> vector<8x256xf32>
    %8 = arith.addf %5, %7 : vector<8x256xf32>
    %c0_10 = arith.constant 0 : index
    %c0_11 = arith.constant 0 : index
    %9 = vector.load %arg7[%c0_10, %c0_11] : memref<8x1xf32, #tpu.memory_space<vmem>>, vector<8x1xf32>
    %10 = vector.broadcast %9 : vector<8x1xf32> to vector<8x256xf32>
    %11 = arith.addf %8, %10 : vector<8x256xf32>
    %cst_12 = arith.constant 0.000000e+00 : f32
    %12 = vector.broadcast %cst_12 : f32 to vector<8x256xf32>
    %13 = arith.maximumf %11, %12 : vector<8x256xf32>
    %c0_13 = arith.constant 0 : index
    %c0_14 = arith.constant 0 : index
    %14 = vector.load %arg8[%c0_13, %c0_14] : memref<1x8xf32, #tpu.memory_space<vmem>>, vector<1x8xf32>
    %cst_15 = arith.constant dense<0.000000e+00> : vector<1x256xf32>
    %15 = tpu.matmul %14, %13, %cst_15 {dimension_numbers = #tpu.dot_dimension_numbers<[1], [0], [0], [1], [0, 0, 1, 1], [], []>} : vector<1x8xf32>, vector<8x256xf32>, vector<1x256xf32> -> vector<1x256xf32>
    %c0_16 = arith.constant 0 : index
    %16 = memref.load %arg2[%c0_16] : memref<1xf32, #tpu.memory_space<smem>>
    %17 = vector.broadcast %16 : f32 to vector<1x256xf32>
    %18 = arith.addf %15, %17 : vector<1x256xf32>
    %19 = arith.negf %18 : vector<1x256xf32>
    %20 = math.exp %19 : vector<1x256xf32>
    %cst_17 = arith.constant 1.000000e+00 : f32
    %21 = vector.broadcast %cst_17 : f32 to vector<1x256xf32>
    %22 = arith.addf %21, %20 : vector<1x256xf32>
    %23 = arith.divf %21, %22 : vector<1x256xf32>
    %c0_18 = arith.constant 0 : index
    %c0_19 = arith.constant 0 : index
    %c0_20 = arith.constant 0 : index
    %24 = vector.load %arg9[%c0_18, %c0_19, %c0_20] : memref<1x1x256xf32, #tpu.memory_space<vmem>>, vector<1x1x256xf32>
    %25 = vector.shape_cast %24 : vector<1x1x256xf32> to vector<1x256xf32>
    %26 = vector.shape_cast %23 : vector<1x256xf32> to vector<1x1x256xf32>
    tpu.vector_store %arg9[%c0_18, %c0_19, %c0_20], %26 {strides = array<i32>} : memref<1x1x256xf32, #tpu.memory_space<vmem>>, vector<1x1x256xf32>,
    return
  }
  func.func @transform_0(%arg0: i32, %arg1: i32, %arg2: memref<1xf32, #tpu.memory_space<smem>>) -> (i32, i32, i32) {
    %c0_i32 = arith.constant 0 : i32
    %c0_i32_0 = arith.constant 0 : i32
    return %arg0, %c0_i32, %arg1 : i32, i32, i32
  }
  func.func @transform_1(%arg0: i32, %arg1: i32, %arg2: memref<1xf32, #tpu.memory_space<smem>>) -> (i32, i32, i32) {
    %c0_i32 = arith.constant 0 : i32
    %c0_i32_0 = arith.constant 0 : i32
    return %arg0, %c0_i32, %arg1 : i32, i32, i32
  }
  func.func @transform_2(%arg0: i32, %arg1: i32, %arg2: memref<1xf32, #tpu.memory_space<smem>>) -> (i32, i32) {
    %c0_i32 = arith.constant 0 : i32
    %c0_i32_0 = arith.constant 0 : i32
    %c0_i32_1 = arith.constant 0 : i32
    return %c0_i32, %c0_i32_0 : i32, i32
  }
  func.func @transform_3(%arg0: i32, %arg1: i32, %arg2: memref<1xf32, #tpu.memory_space<smem>>) -> (i32, i32) {
    %c0_i32 = arith.constant 0 : i32
    %c0_i32_0 = arith.constant 0 : i32
    %c0_i32_1 = arith.constant 0 : i32
    return %c0_i32, %c0_i32_0 : i32, i32
  }
  func.func @transform_4(%arg0: i32, %arg1: i32, %arg2: memref<1xf32, #tpu.memory_space<smem>>) -> (i32, i32) {
    %c0_i32 = arith.constant 0 : i32
    %c0_i32_0 = arith.constant 0 : i32
    %c0_i32_1 = arith.constant 0 : i32
    return %c0_i32, %c0_i32_0 : i32, i32
  }
  func.func @transform_5(%arg0: i32, %arg1: i32, %arg2: memref<1xf32, #tpu.memory_space<smem>>) -> (i32, i32) {
    %c0_i32 = arith.constant 0 : i32
    %c0_i32_0 = arith.constant 0 : i32
    %c0_i32_1 = arith.constant 0 : i32
    return %c0_i32, %c0_i32_0 : i32, i32
  }
  func.func @transform_6(%arg0: i32, %arg1: i32, %arg2: memref<1xf32, #tpu.memory_space<smem>>) -> (i32, i32, i32) {
    %c0_i32 = arith.constant 0 : i32
    %c0_i32_0 = arith.constant 0 : i32
    return %arg0, %c0_i32, %arg1 : i32, i32, i32
  }
}

</mosaic_0001>

<bundles_post_ra>
// kernel: tpu_custom_call.1
= control target key start
LH: loop header
LB: loop body
LE: loop exit
PB: predicated region body
PF: predicated region fallthrough
CT: control target
= control target key end

     0   :  { %s986_s0 = inlined_call_operand.<no memory space> [shape: f32[1], index: 0, kind: input, shape index: {}]   ;;  %s987_s1 = inlined_call_operand.vmem [shape: f32[2,4,256], index: 1, kind: input, shape index: {}]   ;;  %s988_s2 = inlined_call_operand.vmem [shape: f32[2,4,256], index: 2, kind: input, shape index: {}]   ;;  %s989_s3 = inlined_call_operand.vmem [shape: f32[8,4], index: 3, kind: input, shape index: {}]   ;;  %s990_s4 = inlined_call_operand.vmem [shape: f32[8,4], index: 4, kind: input, shape index: {}]   ;;  %s991_s5 = inlined_call_operand.vmem [shape: f32[8,1], index: 5, kind: input, shape index: {}]   ;;  %s992_s6 = inlined_call_operand.vmem [shape: f32[1,8], index: 6, kind: input, shape index: {}]   ;;  %s993_s7 = inlined_call_operand.hbm [shape: f32[2,1,256], index: 7, kind: output, shape index: {}]  }
   0x1   :  { %12 = sst [smem:[#allocation3]] %s986_s0 }
   0x2   :  { %13 = vsyncpa [#allocation5], 0 }
   0x3   :  { %15 = vsyncpa [#allocation5 + $0x1], 0  ;;  %s861_s26 = smov 0   ;;  %s863_s27 = smov 0  }
   0x4   :  { %s865_s28 = smov 0   ;;  %s867_s29 = smov 0  }
   0x5   :  { %s869_s30 = smov 0   ;;  %s871_s8 = smov 0  }
   0x6 LB: > { %s644_s0 = sadd.s32 4294967295, %s815_s8   ;;  %s645_s9 = sadd.s32 4294967294, %s815_s8   ;;  %s815_s8 = sphi %s871_s8, %s21_s8   ;;  %s811_s30 = sphi %s869_s30, %s1002_s30   ;;  %s807_s29 = sphi %s867_s29, %s1001_s29   ;;  %s803_s28 = sphi %s865_s28, %s1000_s28   ;;  %s799_s27 = sphi %s863_s27, %s999_s27   ;;  %s795_s26 = sphi %s861_s26, %s998_s26  }
   0x7   : > { %s33_s10 = sadd.s32 1, %s811_s30  ;;  %s182_s11 = sadd.s32 1, %s803_s28 }
   0x8   : > { %p35_p0 = scmp.ge.s32.totalorder %s33_s10, 2  ;;  %p192_p1 = scmp.ne.s32.totalorder %s803_s28, %s799_s27 }
   0x9   : > { %p193_p2 = scmp.eq.s32.totalorder %s644_s0, 1  ;;  %p198_p3 = scmp.ne.s32.totalorder %s799_s27, %s795_s26 }
   0xa   : > { %s1004_s10 = smov (%p35_p0, %s33_s10), 0  ;;  %p199_p5 = scmp.eq.s32.totalorder %s645_s9, 1 }
   0xb   : > { %p901_p4 = por %p193_p2, %p192_p1  ;;  %s177_s13 = ssub.s32 %s811_s30, %s1004_s10 }
   0xc   : > { %p648_p6 = scmp.ge.s32.totalorder %s815_s8, 1  ;;  %p180_p7 = scmp.eq.s32.totalorder %s177_s13, 0 }
   0xd   : > { %p908_p8 = por %p199_p5, %p198_p3  ;;  %p255_p9 = scmp.lt.s32.totalorder %s815_s8, 3 }
   0xe   : > { %s914_s15 = scalar_select %p180_p7, %s803_s28, %s182_s11  }
   0xf   : > { %p256_p10 = pnand %p648_p6, %p255_p9 }
  0x10   : > { %p299_p11 = scmp.lt.s32.totalorder (!%p256_p10), %s807_s29, 1  ;;  %s667_s21 = sshll.u32 (!%p256_p10), %s807_s29, 1 }
  0x11   : > { %259 = sbr.rel (%p256_p10) target bundleno = 346 (0x15a), region = 44  ;;  %s546_s24 = scalar_lea.hbm (!%p256_p10), %s993_s7, %s667_s21 }
  0x12   : > { %s550_s0 = sshll.u32 (!%p256_p10), %s546_s24, 4  ;;  %s551_s0 = int_to_ptr.hbm [resolvable:$true] %s550_s0 }
  0x13   : > { %s751_s11 = sshra.s32 (!%p256_p10), %s551_s0, 4  ;;  %s752_s11 = int_to_ptr.hbm [resolvable:$true] %s751_s11 }
  0x14   : > { %s753_s13 = scalar_lea.hbm (!%p256_p10), %s752_s11, 2  ;;  %p758_p1 = scmp.lt.s32.totalorder (!%p256_p10), %s752_s11, %s993_s7 }
  0x15   : > { %p754_p12 = scmp.ne.s32.totalorder (!%p256_p10), %s752_s11, %s753_s13 }
  0x16   : > { %v817_v0 = vmov 0   ;;  %v427_v1 = vld [vmem:[%s991_s5] sm:$0xff]  ;;  %s300_s18 = scalar_select %p299_p11, %s807_s29, 1  ;;  %vm331_vm0 = vcmask 1043456   ;;  %vm327_vm1 = vcmask 31744   ;;  %vm440_vm2 = vcmask 64512  }
  0x17   : > { %728 = vset.pattern.permute.xlu0 %v817_v0  ;;  %v322_v4 = vld [vmem:[%s990_s4] sm:$0xff]  ;;  %v528_v48 = vlaneseq  ;;  %vm525_vm10 = vcmask 1040384   ;;  %p755_p13 = pnand %p754_p12, %p901_p4 }
  0x18   : > { %430 = vperm.xlu0 %728, %v427_v1   ;;  %s670_s19 = sshll.u32 %s300_s18, 3  ;;  %v321_v7 = vld [vmem:[%s989_s3] sm:$0xff]  ;;  %s438_s18 = sld [smem:[#allocation3]] }
  0x19   : > { %s316_s22 = scalar_lea.vmem %s988_s2, %s670_s19  ;;  %s306_s25 = scalar_lea.vmem %s987_s1, %s670_s19  ;;  %v437_v21 = vld [vmem:[%s992_s6] sm:$0x1]  ;;  %vm530_vm12 = vcmp.lt.s32.totalorder %v528_v48, 256 }
  0x1a   : > { %v320_v2 = vld [vmem:[%s316_s22] sm:$0xff]  ;;  %s295_s19 = sand.u32 1, %s799_s27   ;;  %p756_p0 = pneg %p755_p13 }
  0x1b   : > { %324 = vst [vmem:[#allocation1] ss:$2 sm:$0xff] %v320_v2  ;;  %v319_v3 = vld [vmem:[%s306_s25] sm:$0xff]  ;;  %s939_s20 = sshll.u32 %s295_s19, 1  ;;  %s534_s9 = scalar_lea.sflag [#allocation5], %s295_s19 }
  0x1c   : > { %s297_s29 = scalar_lea.vmem [#allocation4], %s939_s20 }
  0x1d   : > { %s548_s25 = sshll.u32 %s297_s29, 4  ;;  %s549_s25 = int_to_ptr.vmem [resolvable:$true] %s548_s25 }
  0x1e   : > { %v439_v22 = vstv %s438_s18  ;;  %s757_s18 = scalar_lea.hbm %s993_s7, 4 }
  0x1f   : > { %p759_p2 = scmp.lt.s32.totalorder %s757_s18, %s753_s13 }
  0x21   : > { %p760_p3 = por %p759_p2, %p758_p1 }
  0x22   : > { %v325_v5 = vld.sshfl [vmem:[#allocation1] sm:$0xff pattern:$0x75316420]  ;;  %v326_v6 = vld.sshfl [vmem:[#allocation1 + $0x8] sm:$0xff pattern:$0x75316420] }
  0x23   : > { %377 = vst [vmem:[#allocation1] ss:$2 sm:$0xff] %v319_v3  ;;  %654 = vmatpush.msk.msra.mxu0 %vm331_vm0, %v325_v5  ;;  %656 = vmatpush.msk.msra.mxu1 %vm331_vm0, %v326_v6  ;;  %p761_p5 = pnand %p760_p3, %p756_p0 }
  0x24   : > { %655 = vmatmul.msk.f32.vlgmr.msra.gmra.mxu0 %vm327_vm1, %v322_v4  ;;  %657 = vmatmul.msk.f32.vlgmr.msra.gmra.mxu1 %vm327_vm1, %v322_v4 }
  0x2a   : > { %v378_v8 = vld.sshfl [vmem:[#allocation1] sm:$0xff pattern:$0x75316420]  ;;  %v379_v9 = vld.sshfl [vmem:[#allocation1 + $0x8] sm:$0xff pattern:$0x75316420] }
  0x2b   : > { %658 = vmatpush.msk.msra.mxu2 %vm331_vm0, %v378_v8  ;;  %660 = vmatpush.msk.msra.mxu3 %vm331_vm0, %v379_v9 }
  0x2c   : > { %659 = vmatmul.msk.f32.vlgmr.msra.gmra.mxu2 %vm327_vm1, %v321_v7  ;;  %661 = vmatmul.msk.f32.vlgmr.msra.gmra.mxu3 %vm327_vm1, %v321_v7 }
  0x8a   : > { %v431_v12 = vpop.permute.xlu0 %430 }
  0xa1   : > { %v353_v10 = vpop.f32.mrf.mxu0  ;;  %v373_v11 = vpop.f32.mrf.mxu1 }
  0xaf   : > { %v404_v13 = vpop.f32.mrf.mxu2  ;;  %v424_v14 = vpop.f32.mrf.mxu3 }
  0xb0   : > { %v405_v15 = vadd.f32 %v404_v13, %v353_v10  ;;  %v425_v16 = vadd.f32 %v424_v14, %v373_v11 }
  0xb2   : > { %v433_v17 = vadd.f32 %v431_v12, %v405_v15  ;;  %v434_v18 = vadd.f32 %v431_v12, %v425_v16 }
  0xb4   : > { %v435_v19 = vmax.f32 %v433_v17, 0.0  ;;  %v436_v20 = vmax.f32 %v434_v18, 0.0 }
  0xb6   : > { %459 = vmatpush.msrb.mxu0 %v435_v19  ;;  %479 = vmatpush.msrb.mxu1 %v436_v20 }
  0xb7   : > { %662 = vmatmul.msk.f32.vlgmr.msrb.gmra.mxu0 %vm440_vm2, %v437_v21  ;;  %663 = vmatmul.msk.f32.vlgmr.msrb.gmra.mxu1 %vm440_vm2, %v437_v21 }
 0x134   : > { %v461_v23 = vpop.f32.mrf.mxu0  ;;  %v481_v24 = vpop.f32.mrf.mxu1 }
 0x135   : > { %v462_v25 = vadd.f32 %v461_v23, %v439_v22  ;;  %v482_v26 = vadd.f32 %v481_v24, %v439_v22 }
 0x137   : > { %v664_v27 = vmul.f32 -1.442695, %v462_v25  ;;  %v665_v28 = vmul.f32 -1.442695, %v482_v26 }
 0x139   : > { %729 = vpow2.f32 %v664_v27 }
 0x13a   : > { %731 = vpow2.f32 %v665_v28 }
 0x13f   : > { %v730_v29 = vpop.eup %729 }
 0x140   : > { %v732_v30 = vpop.eup %731  ;;  %v490_v31 = vadd.f32 1.0, %v730_v29 }
 0x141   : > { %v491_v32 = vadd.f32 1.0, %v732_v30 }
 0x142   : > { %733 = vrcp.f32 %v490_v31  ;;  %vm497_vm5 = vweird.f32 %v490_v31  ;;  %v503_v44 = vand.u32 2147483648, %v490_v31  ;;  %v501_v46 = vand.u32 2147483647, %v490_v31 }
 0x143   : > { %735 = vrcp.f32 %v491_v32  ;;  %v518_v40 = vand.u32 2147483648, %v491_v32  ;;  %v516_v42 = vand.u32 2147483647, %v491_v32  ;;  %vm512_vm6 = vweird.f32 %v491_v32 }
 0x144   : > { %v504_v52 = vor.u32 1.1754944e-38, %v503_v44  ;;  %vm502_vm11 = vcmp.eq.f32.partialorder %v501_v46, 8.507059e+37 }
 0x145   : > { %v519_v49 = vor.u32 1.1754944e-38, %v518_v40  ;;  %vm517_vm9 = vcmp.eq.f32.partialorder %v516_v42, 8.507059e+37 }
 0x148   : > { %v734_v33 = vpop.eup %733 }
 0x149   : > { %v736_v34 = vpop.eup %735  ;;  %v493_v35 = vmul.f32 %v734_v33, %v490_v31  ;;  %vm498_vm3 = vweird.f32 %v734_v33 }
 0x14a   : > { %v508_v36 = vmul.f32 %v736_v34, %v491_v32  ;;  %vm513_vm4 = vweird.f32 %v736_v34  ;;  %vm945_vm7 = vmor %vm497_vm5, %vm498_vm3 }
 0x14b   : > { %v494_v37 = vsub.f32 1.0, %v493_v35  ;;  %vm514_vm8 = vmor %vm512_vm6, %vm513_vm4 }
 0x14c   : > { %v509_v38 = vsub.f32 1.0, %v508_v36 }
 0x14d   : > { %v495_v39 = vmul.f32 %v734_v33, %v494_v37 }
 0x14e   : > { %v510_v41 = vmul.f32 %v736_v34, %v509_v38 }
 0x14f   : > { %v496_v43 = vadd.f32 %v734_v33, %v495_v39 }
 0x150   : > { %v511_v47 = vadd.f32 %v736_v34, %v510_v41 }
 0x151   : > { %v500_v50 = vsel %vm945_vm7, %v734_v33, %v496_v43 }
 0x152   : > { %v515_v51 = vsel %vm514_vm8, %v736_v34, %v511_v47  ;;  %v505_v55 = vsel %vm502_vm11, %v504_v52, %v500_v50 }
 0x153   : > { %v520_v53 = vsel %vm517_vm9, %v519_v49, %v515_v51 }
 0x154   : > { %v524_v54 = vrot.slane %v520_v53, 7 }
 0x156   : > { %v526_v56 = vsel %vm525_vm10, %v505_v55, %v524_v54 }
 0x157   : > { %532 = vst.msk [vmem:[%s297_s29] sm:$0x3] %vm530_vm12, %v526_v56 }
 0x158   : > { %764 = shalt.err (!%p761_p5)
}
 0x159   : > { %672 = dma.vmem_to_hbm [thread:$0]  (%p901_p4), %s549_s25, 32, %s551_s0, %s534_s9  }
 0x15a PF: > { %p678_p6 = scmp.ge.s32.totalorder %s815_s8, 2  ;;  %s562_s19 = sand.u32 1, %s795_s26  }
 0x15b   : > { %s563_s22 = scalar_lea.sflag [#allocation5], %s562_s19 }
 0x15c   : > { %p675_p7 = pnand %p678_p6, %p908_p8 }
 0x15e   : > { %p676_p9 = pneg %p675_p7 }
 0x160   : > { %790 = dma.done.wait (%p676_p9), %s563_s22, 32  }
 0x161   : > { %792 = vsyncadd (%p676_p9), %s563_s22, 4294967264  ;;  %s21_s8 = sadd.s32 1, %s815_s8   ;;  %s998_s26 = smov %s799_s27 }
 0x162   : > { %p18_p10 = scmp.ge.s32.totalorder %s21_s8, 4   ;;  %s999_s27 = smov %s803_s28 }
 0x163   : > { %s1000_s28 = smov %s914_s15  ;;  %s1001_s29 = smov %s811_s30 }
 0x164   : > { %s1002_s30 = smov %s1004_s10  ;;  %20 = sbr.rel (!%p18_p10) target bundleno = 6 (0x6), region = 82 }
 0x169   :  { %569 = vsyncpa [#allocation5], 1 }
 0x16a   :  { %571 = vsyncpa [#allocation5 + $0x1], 1 }

</bundles_post_ra>
